<compile_context>
chip_gen: v5e
topology: v5e:2x2
jax: 0.10.0
libtpu: 0.0.40
codegen_flags: <defaults>
</compile_context>

<pallas_src>
import functools

import jax
import jax.numpy as jnp
from jax.experimental import pallas as pl
from jax.experimental.pallas import tpu as pltpu

LANES = 128
SUBLANES = 8
MAX_TILE_ROWS = 8192  # 4 MiB f32 per input per tile; multiple of 8.


def _partial_sums_kernel(x_ref, t_ref, acc_ref, *, tile_rows, valid_rows,
                         needs_mask):
    i = pl.program_id(0)

    @pl.when(i == 0)
    def _init():
        acc_ref[...] = jnp.zeros_like(acc_ref)

    x = x_ref[...].astype(jnp.float32)
    t = t_ref[...].astype(jnp.float32)

    xt = x * t        # intersection terms
    xpt = x + t       # merged sum(x) + sum(t) (dice denominator)

    # Elementwise binary cross entropy (PyTorch clamps log at -100).
    logp = jnp.maximum(jnp.log(x), -100.0)
    log1mp = jnp.maximum(jnp.log(1.0 - x), -100.0)
    bce = -(log1mp + t * (logp - log1mp))

    if needs_mask:
        # Only whole out-of-bounds rows of the ragged last block need masking
        # (there is no element-level host padding any more), so a single row
        # iota + compare suffices; NaN/garbage in the OOB rows is discarded
        # by the selects before it can reach the sums.
        row = jax.lax.broadcasted_iota(jnp.int32, (tile_rows, LANES), 0)
        valid = (i * tile_rows + row) < valid_rows
        xt = jnp.where(valid, xt, 0.0)
        xpt = jnp.where(valid, xpt, 0.0)
        bce = jnp.where(valid, bce, 0.0)

    # Block-local reduction in registers: (R,128) -> (R/8, 8, 128), VPU sum
    # over the leading axis -> one (8,128) vreg per quantity.  Only that vreg
    # touches the resident output accumulator.
    def bsum(v):
        return jnp.sum(v.reshape(tile_rows // SUBLANES, SUBLANES, LANES),
                       axis=0)

    acc_ref[0] += bsum(xt)
    acc_ref[1] += bsum(xpt)
    acc_ref[2] += bsum(bce)


def _elem_partial_sums(x, t):
    """Plain-JAX partial sums (used for the <128-element tail / tiny inputs)."""
    x = x.astype(jnp.float32)
    t = t.astype(jnp.float32)
    logp = jnp.maximum(jnp.log(x), -100.0)
    log1mp = jnp.maximum(jnp.log(1.0 - x), -100.0)
    bce = -(log1mp + t * (logp - log1mp))
    return jnp.sum(x * t), jnp.sum(x + t), jnp.sum(bce)


def binary_mask_loss(inputs, targets, weight=0.8, smooth=1.0):
    x = inputs.reshape(-1)
    t = targets.reshape(-1)
    n = x.shape[0]

    n_bulk = (n // LANES) * LANES
    rows = n_bulk // LANES

    inter = jnp.float32(0.0)
    sxpt = jnp.float32(0.0)
    sbce = jnp.float32(0.0)

    if rows > 0:
        tile_rows = min(MAX_TILE_ROWS,
                        ((rows + SUBLANES - 1) // SUBLANES) * SUBLANES)
        num_blocks = -(-rows // tile_rows)
        needs_mask = (num_blocks * tile_rows) != rows

        # Zero-copy bitcast when n % 128 == 0 (the common case).
        # TODO(synk): when n % 128 != 0 the prefix slice still materializes a
        # copy of the bulk; a fully zero-copy path would need
        # memory_space=pl.ANY + manual DMA.
        x2 = (x if n_bulk == n else x[:n_bulk]).reshape(rows, LANES)
        t2 = (t if n_bulk == n else t[:n_bulk]).reshape(rows, LANES)

        kernel = functools.partial(
            _partial_sums_kernel,
            tile_rows=int(tile_rows),
            valid_rows=int(rows),
            needs_mask=bool(needs_mask),
        )

        partials = pl.pallas_call(
            kernel,
            out_shape=jax.ShapeDtypeStruct((3, SUBLANES, LANES), jnp.float32),
            grid_spec=pltpu.PrefetchScalarGridSpec(
                num_scalar_prefetch=0,
                grid=(num_blocks,),
                in_specs=[
                    pl.BlockSpec((tile_rows, LANES), lambda i: (i, 0)),
                    pl.BlockSpec((tile_rows, LANES), lambda i: (i, 0)),
                ],
                # Resident output block accumulated across the whole grid;
                # written back to HBM once.
                out_specs=pl.BlockSpec((3, SUBLANES, LANES),
                                       lambda i: (0, 0, 0)),
            ),
            compiler_params=pltpu.CompilerParams(
                dimension_semantics=("arbitrary",),
                vmem_limit_bytes=32 * 1024 * 1024),
        )(x2, t2)

        inter = inter + jnp.sum(partials[0])
        sxpt = sxpt + jnp.sum(partials[1])
        sbce = sbce + jnp.sum(partials[2])

    if n_bulk != n:
        # Sub-lane tail (< 128 elements): negligible, handled in plain JAX.
        ti, ts, tb = _elem_partial_sums(x[n_bulk:], t[n_bulk:])
        inter = inter + ti
        sxpt = sxpt + ts
        sbce = sbce + tb

    # Tiny scalar epilogue (dice + focal combine).
    dice = (2.0 * inter + smooth) / (sxpt + smooth)
    dice_score = 1.0 - dice
    bce_mean = sbce / float(n)
    bce_exp = jnp.exp(-bce_mean)
    focal = 0.8 * (1.0 - bce_exp) ** 2 * bce_mean
    return weight * dice_score + (1.0 - weight) * focal


def _reference_loss(inputs, targets, weight=0.8, smooth=1.0):
    x = inputs.astype(jnp.float32).reshape(-1)
    t = targets.astype(jnp.float32).reshape(-1)
    inter = jnp.sum(x * t)
    dice = (2.0 * inter + smooth) / (jnp.sum(x) + jnp.sum(t) + smooth)
    bce = jnp.mean(-(t * jnp.maximum(jnp.log(x), -100.0)
                     + (1.0 - t) * jnp.maximum(jnp.log(1.0 - x), -100.0)))
    focal = 0.8 * (1.0 - jnp.exp(-bce)) ** 2 * bce
    return weight * (1.0 - dice) + (1.0 - weight) * focal


if __name__ == "__main__":
    key = jax.random.PRNGKey(0)
    k_in, k_tgt = jax.random.split(key)

    # NCHW: batch=2, channels=4, spatial=16x16 (probabilities + 0/1 labels).
    inputs = jax.random.uniform(k_in, (2, 4, 16, 16), dtype=jnp.float32,
                                minval=0.01, maxval=0.99)
    # Targets as bf16 (0/1 exact) — halves target HBM traffic; kernel upcasts.
    targets = jax.random.bernoulli(k_tgt, 0.5, (2, 4, 16, 16)).astype(jnp.bfloat16)

    loss = jax.block_until_ready(binary_mask_loss(inputs, targets))
    ref = jax.block_until_ready(_reference_loss(inputs, targets))
    assert jnp.allclose(loss, ref, rtol=1e-5, atol=1e-6), (loss, ref)

    print("KERNEL_OK")
</pallas_src>

<mosaic_0001>
module attributes {stable_mosaic.version = 11 : i64} {
  func.func @_partial_sums_kernel(%arg0: i32, %arg1: memref<16x128xf32, #tpu.memory_space<vmem>>, %arg2: memref<16x128xbf16, #tpu.memory_space<vmem>>, %arg3: memref<3x8x128xf32, #tpu.memory_space<vmem>>) attributes {dimension_semantics = [#tpu.dimension_semantics<arbitrary>], iteration_bounds = array<i64: 1>, scalar_prefetch = 0 : i64, scratch_operands = 0 : i64, tpu.core_type = #tpu.core_type<tc>, window_params = [{transform_indices = @transform_0, window_bounds = array<i64: 16, 128>}, {transform_indices = @transform_1, window_bounds = array<i64: 16, 128>}, {pipeline_mode = #tpu.pipeline_mode<synchronous>, transform_indices = @transform_2, window_bounds = array<i64: 3, 8, 128>}]} {
    %c0_i32 = arith.constant 0 : i32
    %0 = arith.cmpi eq, %arg0, %c0_i32 : i32
    %1 = arith.extui %0 : i1 to i32
    %c0_i32_0 = arith.constant 0 : i32
    %2 = arith.cmpi ne, %1, %c0_i32_0 : i32
    scf.if %2 {
      %cst_26 = arith.constant 0.000000e+00 : f32
      %45 = vector.broadcast %cst_26 : f32 to vector<3x8x128xf32>
      %c0_27 = arith.constant 0 : index
      %c0_28 = arith.constant 0 : index
      %c0_29 = arith.constant 0 : index
      %46 = vector.load %arg3[%c0_27, %c0_28, %c0_29] : memref<3x8x128xf32, #tpu.memory_space<vmem>>, vector<3x8x128xf32>
      tpu.vector_store %arg3[%c0_27, %c0_28, %c0_29], %45 {strides = array<i32>} : memref<3x8x128xf32, #tpu.memory_space<vmem>>, vector<3x8x128xf32>,
    } else {
    }
    %c0 = arith.constant 0 : index
    %c0_1 = arith.constant 0 : index
    %3 = vector.load %arg1[%c0, %c0_1] : memref<16x128xf32, #tpu.memory_space<vmem>>, vector<16x128xf32>
    %c0_2 = arith.constant 0 : index
    %c0_3 = arith.constant 0 : index
    %4 = vector.load %arg2[%c0_2, %c0_3] : memref<16x128xbf16, #tpu.memory_space<vmem>>, vector<16x128xbf16>
    %5 = arith.extf %4 : vector<16x128xbf16> to vector<16x128xf32>
    %6 = arith.mulf %3, %5 : vector<16x128xf32>
    %7 = arith.addf %3, %5 : vector<16x128xf32>
    %8 = math.log %3 : vector<16x128xf32>
    %cst = arith.constant -1.000000e+02 : f32
    %9 = vector.broadcast %cst : f32 to vector<16x128xf32>
    %10 = arith.maximumf %8, %9 : vector<16x128xf32>
    %cst_4 = arith.constant 1.000000e+00 : f32
    %11 = vector.broadcast %cst_4 : f32 to vector<16x128xf32>
    %12 = arith.subf %11, %3 : vector<16x128xf32>
    %13 = math.log %12 : vector<16x128xf32>
    %cst_5 = arith.constant -1.000000e+02 : f32
    %14 = vector.broadcast %cst_5 : f32 to vector<16x128xf32>
    %15 = arith.maximumf %13, %14 : vector<16x128xf32>
    %16 = arith.subf %10, %15 : vector<16x128xf32>
    %17 = arith.mulf %5, %16 : vector<16x128xf32>
    %18 = arith.addf %15, %17 : vector<16x128xf32>
    %cst_6 = arith.constant 0.000000e+00 : f32
    %19 = vector.broadcast %cst_6 : f32 to vector<16x128xf32>
    %20 = arith.subf %19, %18 : vector<16x128xf32>
    %c0_7 = arith.constant 0 : index
    %c0_8 = arith.constant 0 : index
    %c0_9 = arith.constant 0 : index
    %21 = vector.load %arg3[%c0_7, %c0_8, %c0_9] : memref<3x8x128xf32, #tpu.memory_space<vmem>>, vector<1x8x128xf32>
    %22 = vector.shape_cast %21 : vector<1x8x128xf32> to vector<8x128xf32>
    %23 = vector.shape_cast %6 : vector<16x128xf32> to vector<2x8x128xf32>
    %cst_10 = arith.constant dense<0.000000e+00> : vector<8x128xf32>
    %24 = vector.multi_reduction <add>, %23, %cst_10 [0] : vector<2x8x128xf32> to vector<8x128xf32>
    %25 = arith.addf %22, %24 : vector<8x128xf32>
    %c0_11 = arith.constant 0 : index
    %c0_12 = arith.constant 0 : index
    %c0_13 = arith.constant 0 : index
    %26 = vector.load %arg3[%c0_11, %c0_12, %c0_13] : memref<3x8x128xf32, #tpu.memory_space<vmem>>, vector<1x8x128xf32>
    %27 = vector.shape_cast %26 : vector<1x8x128xf32> to vector<8x128xf32>
    %28 = vector.shape_cast %25 : vector<8x128xf32> to vector<1x8x128xf32>
    tpu.vector_store %arg3[%c0_11, %c0_12, %c0_13], %28 {strides = array<i32>} : memref<3x8x128xf32, #tpu.memory_space<vmem>>, vector<1x8x128xf32>,
    %c1 = arith.constant 1 : index
    %c0_14 = arith.constant 0 : index
    %c0_15 = arith.constant 0 : index
    %29 = vector.load %arg3[%c1, %c0_14, %c0_15] : memref<3x8x128xf32, #tpu.memory_space<vmem>>, vector<1x8x128xf32>
    %30 = vector.shape_cast %29 : vector<1x8x128xf32> to vector<8x128xf32>
    %31 = vector.shape_cast %7 : vector<16x128xf32> to vector<2x8x128xf32>
    %cst_16 = arith.constant dense<0.000000e+00> : vector<8x128xf32>
    %32 = vector.multi_reduction <add>, %31, %cst_16 [0] : vector<2x8x128xf32> to vector<8x128xf32>
    %33 = arith.addf %30, %32 : vector<8x128xf32>
    %c1_17 = arith.constant 1 : index
    %c0_18 = arith.constant 0 : index
    %c0_19 = arith.constant 0 : index
    %34 = vector.load %arg3[%c1_17, %c0_18, %c0_19] : memref<3x8x128xf32, #tpu.memory_space<vmem>>, vector<1x8x128xf32>
    %35 = vector.shape_cast %34 : vector<1x8x128xf32> to vector<8x128xf32>
    %36 = vector.shape_cast %33 : vector<8x128xf32> to vector<1x8x128xf32>
    tpu.vector_store %arg3[%c1_17, %c0_18, %c0_19], %36 {strides = array<i32>} : memref<3x8x128xf32, #tpu.memory_space<vmem>>, vector<1x8x128xf32>,
    %c2 = arith.constant 2 : index
    %c0_20 = arith.constant 0 : index
    %c0_21 = arith.constant 0 : index
    %37 = vector.load %arg3[%c2, %c0_20, %c0_21] : memref<3x8x128xf32, #tpu.memory_space<vmem>>, vector<1x8x128xf32>
    %38 = vector.shape_cast %37 : vector<1x8x128xf32> to vector<8x128xf32>
    %39 = vector.shape_cast %20 : vector<16x128xf32> to vector<2x8x128xf32>
    %cst_22 = arith.constant dense<0.000000e+00> : vector<8x128xf32>
    %40 = vector.multi_reduction <add>, %39, %cst_22 [0] : vector<2x8x128xf32> to vector<8x128xf32>
    %41 = arith.addf %38, %40 : vector<8x128xf32>
    %c2_23 = arith.constant 2 : index
    %c0_24 = arith.constant 0 : index
    %c0_25 = arith.constant 0 : index
    %42 = vector.load %arg3[%c2_23, %c0_24, %c0_25] : memref<3x8x128xf32, #tpu.memory_space<vmem>>, vector<1x8x128xf32>
    %43 = vector.shape_cast %42 : vector<1x8x128xf32> to vector<8x128xf32>
    %44 = vector.shape_cast %41 : vector<8x128xf32> to vector<1x8x128xf32>
    tpu.vector_store %arg3[%c2_23, %c0_24, %c0_25], %44 {strides = array<i32>} : memref<3x8x128xf32, #tpu.memory_space<vmem>>, vector<1x8x128xf32>,
    return
  }
  func.func @transform_0(%arg0: i32) -> (i32, i32) {
    %c0_i32 = arith.constant 0 : i32
    %c0_i32_0 = arith.constant 0 : i32
    return %arg0, %c0_i32 : i32, i32
  }
  func.func @transform_1(%arg0: i32) -> (i32, i32) {
    %c0_i32 = arith.constant 0 : i32
    %c0_i32_0 = arith.constant 0 : i32
    return %arg0, %c0_i32 : i32, i32
  }
  func.func @transform_2(%arg0: i32) -> (i32, i32, i32) {
    %c0_i32 = arith.constant 0 : i32
    %c0_i32_0 = arith.constant 0 : i32
    %c0_i32_1 = arith.constant 0 : i32
    %c0_i32_2 = arith.constant 0 : i32
    return %c0_i32, %c0_i32_0, %c0_i32_1 : i32, i32, i32
  }
}

</mosaic_0001>

<bundles_post_ra>
// kernel: tpu_custom_call.1
= control target key start
LH: loop header
LB: loop body
LE: loop exit
PB: predicated region body
PF: predicated region fallthrough
CT: control target
= control target key end

     0   :  { %7 = vsyncpa [#allocation3], 0  ;;  %s252_s0 = inlined_call_operand.hbm [shape: f32[16,128], index: 0, kind: input, shape index: {}]   ;;  %s253_s1 = inlined_call_operand.hbm [shape: bf16[16,128], index: 1, kind: input, shape index: {}]   ;;  %s254_s2 = inlined_call_operand.hbm [shape: f32[3,8,128], index: 2, kind: output, shape index: {}]  }
   0x1   :  { %8 = vsyncpa [#allocation6], 0 }
   0x2   :  { %9 = vsyncpa [#allocation4], 0  ;;  %s14_s11 = sshll.u32 %s252_s0, 4  ;;  %s215_s12 = smov [#allocation2]   ;;  %s15_s11 = int_to_ptr.hbm [resolvable:$true] %s14_s11 }
   0x3   :  { %s16_s13 = sshll.u32 %s215_s12, 4  ;;  %s27_s16 = sshll.u32 %s253_s1, 4  ;;  %s17_s13 = int_to_ptr.vmem [resolvable:$true] %s16_s13  ;;  %s28_s16 = int_to_ptr.hbm [resolvable:$true] %s27_s16 }
   0x4   :  { %s216_s17 = smov 128   ;;  %s217_s18 = smov 8  }
   0x5   :  { %22 = dma.hbm_to_vmem [thread:$0]  %s15_s11, 256, %s17_s13, [#allocation3], %s216_s17, %s216_s17, %s217_s18  }
   0x6   :  { %s218_s19 = smov [#allocation5]   ;;  %s219_s21 = smov 64  }
   0x7   :  { %s29_s20 = sshll.u32 %s218_s19, 4  ;;  %s220_s0 = smov 4   ;;  %s30_s20 = int_to_ptr.vmem [resolvable:$true] %s29_s20 }
   0x8   :  { %35 = dma.hbm_to_vmem [thread:$0]  %s28_s16, 128, %s30_s20, [#allocation6], %s219_s21, %s219_s21, %s220_s0  }
   0x9   :  { %209 = dma.done.wait [#allocation3], 256  }
   0xa   :  { %210 = vsyncadd [#allocation3], 4294967040 }
   0xb   :  { %211 = dma.done.wait [#allocation6], 128  }
   0xc   :  { %212 = vsyncadd [#allocation6], 4294967168  ;;  %v51_v0 = vld [vmem:[#allocation2] sm:$0xff]  ;;  %v52_v1 = vld [vmem:[#allocation2 + $0x8] sm:$0xff]  ;;  %s221_s1 = smov [#allocation7]   ;;  %s103_s25 = sshll.u32 %s254_s2, 4  ;;  %s104_s25 = int_to_ptr.hbm [resolvable:$true] %s103_s25 }
   0xd   :  { %v118_v2 = vld [vmem:[#allocation5] sm:$0xff]   ;;  %129 = vlog2.f32 %v51_v0  ;;  %v67_v5 = vsub.f32 1.0, %v51_v0  ;;  %v68_v6 = vsub.f32 1.0, %v52_v1  ;;  %s101_s22 = sshll.u32 %s221_s1, 4  ;;  %s102_s22 = int_to_ptr.vmem [resolvable:$true] %s101_s22 }
   0xe   :  { %v119_v3 = vunpack.c.l.bf16 %v118_v2  ;;  %v120_v4 = vunpack.c.h.bf16 %v118_v2  ;;  %131 = vlog2.f32 %v52_v1 }
   0xf   :  { %133 = vlog2.f32 %v67_v5 }
  0x10   :  { %v57_v7 = vmul.f32 %v119_v3, %v51_v0  ;;  %v58_v8 = vmul.f32 %v120_v4, %v52_v1  ;;  %v59_v9 = vadd.f32 %v119_v3, %v51_v0  ;;  %v60_v10 = vadd.f32 %v120_v4, %v52_v1 }
  0x11   :  { %135 = vlog2.f32 %v68_v6 }
  0x12   :  { %v84_v11 = vadd.f32 %v58_v8, %v57_v7  ;;  %v89_v12 = vadd.f32 %v60_v10, %v59_v9 }
  0x13   :  { %v130_v13 = vpop.eup %129 }
  0x14   :  { %v132_v14 = vpop.eup %131  ;;  %v62_v15 = vmul.f32 0.6931472, %v130_v13  ;;  %86 = vst [vmem:[#allocation7] sm:$0xff] %v84_v11 }
  0x15   :  { %v64_v16 = vmul.f32 0.6931472, %v132_v14  ;;  %v134_v17 = vpop.eup %133  ;;  %91 = vst [vmem:[#allocation7 + $0x8] sm:$0xff] %v89_v12 }
  0x16   :  { %v65_v19 = vmax.f32 %v62_v15, -100.0  ;;  %v70_v20 = vmul.f32 0.6931472, %v134_v17 }
  0x17   :  { %v136_v18 = vpop.eup %135  ;;  %v66_v21 = vmax.f32 %v64_v16, -100.0 }
  0x18   :  { %v72_v22 = vmul.f32 0.6931472, %v136_v18  ;;  %v73_v23 = vmax.f32 %v70_v20, -100.0 }
  0x1a   :  { %v74_v24 = vmax.f32 %v72_v22, -100.0  ;;  %v75_v25 = vsub.f32 %v65_v19, %v73_v23 }
  0x1c   :  { %v76_v26 = vsub.f32 %v66_v21, %v74_v24  ;;  %v77_v27 = vmul.f32 %v119_v3, %v75_v25 }
  0x1e   :  { %v78_v28 = vmul.f32 %v120_v4, %v76_v26  ;;  %v79_v29 = vadd.f32 %v77_v27, %v73_v23 }
  0x20   :  { %v80_v30 = vadd.f32 %v78_v28, %v74_v24  ;;  %v81_v31 = vsub.f32 0.0, %v79_v29 }
  0x22   :  { %v82_v32 = vsub.f32 0.0, %v80_v30 }
  0x24   :  { %v94_v33 = vadd.f32 %v82_v32, %v81_v31 }
  0x26   :  { %96 = vst [vmem:[#allocation7 + $0x10] sm:$0xff] %v94_v33 }
  0x27   :  { %109 = dma.vmem_to_hbm [thread:$0]  %s102_s22, 384, %s104_s25, [#allocation4], %s216_s17, %s216_s17, %s217_s18  }
  0x28   :  { %213 = dma.done.wait [#allocation4], 384  }
  0x29   :  { %214 = vsyncadd [#allocation4], 4294966912 }
  0x2a   :  { %114 = vsyncpa [#allocation3], 1 }
  0x2b   :  { %115 = vsyncpa [#allocation6], 1 }
  0x2c   :  { %116 = vsyncpa [#allocation4], 1 }

</bundles_post_ra>
